<compile_context>
chip_gen: v6e
topology: v6e:2x2x1
jax: 0.10.0
libtpu: 0.0.40
codegen_flags: <defaults>
</compile_context>

<pallas_src>
import math

import jax
import jax.numpy as jnp
from jax.experimental import pallas as pl
from jax.experimental.pallas import tpu as pltpu

IN_SIZE = 28 * 28
LAYER_NUM = 3
LAYER_SIZE = 256
OUT_SIZE = 10
OUT_PAD = 128            # lane-dense padded output width
MAX_BT = 1024            # max batch-tile rows; fits the 32 MiB scoped VMEM budget


def _sigmoid(y):
    """sigmoid via exp + approx reciprocal: both ride the EUP slot, relieving
    the VALU compared to the numerically-stable where/select lowering.
    Precision (~EUP approx recip) is far above bf16 output precision."""
    return pl.reciprocal(1.0 + jnp.exp(-y), approx=True)


def _mlp_fused_kernel(x_ref,
                      w1_ref, b1_ref,
                      w2_ref, b2_ref,
                      w3_ref, b3_ref,
                      w4_ref, b4_ref,
                      o_ref):
    """Fused 4-layer MLP: (Linear -> sigmoid) x 4, all in VMEM/vregs."""
    a = x_ref[...]  # (bt, 784) bf16

    # hidden_1
    y = jnp.dot(a, w1_ref[...], preferred_element_type=jnp.float32) + b1_ref[...]
    a = _sigmoid(y).astype(jnp.bfloat16)

    # hidden_2
    y = jnp.dot(a, w2_ref[...], preferred_element_type=jnp.float32) + b2_ref[...]
    a = _sigmoid(y).astype(jnp.bfloat16)

    # hidden_3
    y = jnp.dot(a, w3_ref[...], preferred_element_type=jnp.float32) + b3_ref[...]
    a = _sigmoid(y).astype(jnp.bfloat16)

    # output layer (zero-padded to 128 cols -> lane-dense, unmasked store)
    y = jnp.dot(a, w4_ref[...], preferred_element_type=jnp.float32) + b4_ref[...]
    o_ref[...] = _sigmoid(y).astype(o_ref.dtype)


def init_mlp_params(key, in_size=IN_SIZE, layer_size=LAYER_SIZE,
                    layer_num=LAYER_NUM, out_size=OUT_SIZE):
    """Deterministic init mimicking PyTorch nn.Linear default U(-1/sqrt(fan_in), +)."""
    dims = [in_size] + [layer_size] * layer_num + [out_size]
    params = []
    for i in range(len(dims) - 1):
        fan_in, fan_out = dims[i], dims[i + 1]
        key, kw, kb = jax.random.split(key, 3)
        bound = 1.0 / math.sqrt(fan_in)
        w = jax.random.uniform(kw, (fan_in, fan_out), jnp.float32, -bound, bound)
        b = jax.random.uniform(kb, (1, fan_out), jnp.float32, -bound, bound)
        params.append((w, b))
    return params


def prepare_params(params):
    """Cast weights to bf16 (MXU path) and zero-pad the last layer to 128 cols.
    Biases stay f32 (added to the f32 accumulator)."""
    prepped = []
    for i, (w, b) in enumerate(params):
        if i == len(params) - 1:
            w = jnp.pad(w, ((0, 0), (0, OUT_PAD - w.shape[1])))
            b = jnp.pad(b, ((0, 0), (0, OUT_PAD - b.shape[1])))
        prepped.append((w.astype(jnp.bfloat16), b.astype(jnp.float32)))
    return prepped


def _pick_bt(B):
    """Batch tile: multiple of 8, as large as the VMEM budget allows (<=1024),
    but always yielding >= 2 grid steps when the batch permits so v7x's two
    TensorCores both get work on the 'parallel' batch axis."""
    if B <= 8:
        return 8
    half = ((((B + 1) // 2) + 7) // 8) * 8   # round ceil(B/2) up to multiple of 8
    return max(8, min(MAX_BT, half))


def _fused_call(x_bf16, prepped):
    """One pallas_call over a batch-tiled grid. Weights/biases are full blocks
    (VMEM-resident; constant index_map so they are never re-DMA'd across grid
    steps); only x / out are tiled on batch, with a ragged last tile."""
    B, K = x_bf16.shape
    (w1, b1), (w2, b2), (w3, b3), (w4, b4) = prepped

    bt = _pick_bt(B)
    grid = (pl.cdiv(B, bt),)   # ragged last tile handled by Pallas; no jnp.pad copy of x

    def full(arr):
        return pl.BlockSpec(arr.shape, lambda i: (0,) * arr.ndim)

    out = pl.pallas_call(
        _mlp_fused_kernel,
        out_shape=jax.ShapeDtypeStruct((B, OUT_PAD), jnp.bfloat16),
        grid=grid,
        in_specs=[
            pl.BlockSpec((bt, K), lambda i: (i, 0)),            # x batch tile
            full(w1), full(b1),
            full(w2), full(b2),
            full(w3), full(b3),
            full(w4), full(b4),
        ],
        out_specs=pl.BlockSpec((bt, OUT_PAD), lambda i: (i, 0)),
        compiler_params=pltpu.CompilerParams(
            dimension_semantics=("parallel",),
            vmem_limit_bytes=32 * 1024 * 1024),
    )(x_bf16, w1, b1, w2, b2, w3, b3, w4, b4)

    # Padded cols (sigmoid(0)=0.5) are sliced off; cast back to f32 for callers.
    return out[:, :OUT_SIZE].astype(jnp.float32)


@jax.jit
def mlp_forward(x, prepped_params):
    return _fused_call(x.astype(jnp.bfloat16), prepped_params)


def _reference(x, params):
    """Plain-JAX reference with matching precision (bf16 weights, f32 accum)."""
    a = x
    for i, (w, b) in enumerate(params):
        y = jnp.dot(a.astype(jnp.bfloat16), w.astype(jnp.bfloat16),
                    preferred_element_type=jnp.float32) + b
        a = jax.nn.sigmoid(y)
        if i < len(params) - 1:
            a = a.astype(jnp.bfloat16).astype(jnp.float32)
    return a


if __name__ == "__main__":
    key = jax.random.PRNGKey(0)
    params = init_mlp_params(key)
    prepped = prepare_params(params)

    # Small, deterministic test: even batch (single full tile) + odd batch
    # (exercises the ragged last tile / multi-step grid path).
    for batch in (8, 13):
        key, kx = jax.random.split(key)
        x = jax.random.normal(kx, (batch, IN_SIZE), jnp.float32)

        out = mlp_forward(x, prepped)
        out = jax.block_until_ready(out)
        assert out.shape == (batch, OUT_SIZE)
        assert bool(jnp.all(jnp.isfinite(out)))

        ref = _reference(x, params)
        assert bool(jnp.allclose(out, ref, atol=3e-2, rtol=3e-2))

    print("KERNEL_OK")
</pallas_src>

<mosaic_0001>
module attributes {stable_mosaic.version = 11 : i64} {
  func.func @_mlp_fused_kernel(%arg0: i32, %arg1: memref<8x784xbf16, #tpu.memory_space<vmem>>, %arg2: memref<784x256xbf16, #tpu.memory_space<vmem>>, %arg3: memref<1x256xf32, #tpu.memory_space<vmem>>, %arg4: memref<256x256xbf16, #tpu.memory_space<vmem>>, %arg5: memref<1x256xf32, #tpu.memory_space<vmem>>, %arg6: memref<256x256xbf16, #tpu.memory_space<vmem>>, %arg7: memref<1x256xf32, #tpu.memory_space<vmem>>, %arg8: memref<256x128xbf16, #tpu.memory_space<vmem>>, %arg9: memref<1x128xf32, #tpu.memory_space<vmem>>, %arg10: memref<8x128xbf16, #tpu.memory_space<vmem>>) attributes {dimension_semantics = [#tpu.dimension_semantics<parallel>], iteration_bounds = array<i64: 1>, scalar_prefetch = 0 : i64, scratch_operands = 0 : i64, tpu.core_type = #tpu.core_type<tc>, window_params = [{transform_indices = @transform_0, window_bounds = array<i64: 8, 784>}, {pipeline_mode = #tpu.pipeline_mode<synchronous>, transform_indices = @transform_1, window_bounds = array<i64: 784, 256>}, {pipeline_mode = #tpu.pipeline_mode<synchronous>, transform_indices = @transform_2, window_bounds = array<i64: 1, 256>}, {pipeline_mode = #tpu.pipeline_mode<synchronous>, transform_indices = @transform_3, window_bounds = array<i64: 256, 256>}, {pipeline_mode = #tpu.pipeline_mode<synchronous>, transform_indices = @transform_4, window_bounds = array<i64: 1, 256>}, {pipeline_mode = #tpu.pipeline_mode<synchronous>, transform_indices = @transform_5, window_bounds = array<i64: 256, 256>}, {pipeline_mode = #tpu.pipeline_mode<synchronous>, transform_indices = @transform_6, window_bounds = array<i64: 1, 256>}, {pipeline_mode = #tpu.pipeline_mode<synchronous>, transform_indices = @transform_7, window_bounds = array<i64: 256, 128>}, {pipeline_mode = #tpu.pipeline_mode<synchronous>, transform_indices = @transform_8, window_bounds = array<i64: 1, 128>}, {transform_indices = @transform_9, window_bounds = array<i64: 8, 128>}]} {
    %c0 = arith.constant 0 : index
    %c0_0 = arith.constant 0 : index
    %0 = vector.load %arg1[%c0, %c0_0] : memref<8x784xbf16, #tpu.memory_space<vmem>>, vector<8x784xbf16>
    %c0_1 = arith.constant 0 : index
    %c0_2 = arith.constant 0 : index
    %1 = vector.load %arg2[%c0_1, %c0_2] : memref<784x256xbf16, #tpu.memory_space<vmem>>, vector<784x256xbf16>
    %cst = arith.constant dense<0.000000e+00> : vector<8x256xf32>
    %2 = tpu.matmul %0, %1, %cst {dimension_numbers = #tpu.dot_dimension_numbers<[1], [0], [0], [1], [0, 0, 1, 1], [], []>} : vector<8x784xbf16>, vector<784x256xbf16>, vector<8x256xf32> -> vector<8x256xf32>
    %c0_3 = arith.constant 0 : index
    %c0_4 = arith.constant 0 : index
    %3 = vector.load %arg3[%c0_3, %c0_4] : memref<1x256xf32, #tpu.memory_space<vmem>>, vector<1x256xf32>
    %4 = vector.broadcast %3 : vector<1x256xf32> to vector<8x256xf32>
    %5 = arith.addf %2, %4 : vector<8x256xf32>
    %cst_5 = arith.constant 0.000000e+00 : f32
    %6 = vector.broadcast %cst_5 : f32 to vector<8x256xf32>
    %7 = arith.subf %6, %5 : vector<8x256xf32>
    %8 = math.exp %7 : vector<8x256xf32>
    %cst_6 = arith.constant 1.000000e+00 : f32
    %9 = vector.broadcast %cst_6 : f32 to vector<8x256xf32>
    %10 = arith.addf %9, %8 : vector<8x256xf32>
    %11 = tpu.reciprocal %10 {approx = true} : vector<8x256xf32> -> vector<8x256xf32>
    %12 = arith.truncf %11 : vector<8x256xf32> to vector<8x256xbf16>
    %c0_7 = arith.constant 0 : index
    %c0_8 = arith.constant 0 : index
    %13 = vector.load %arg4[%c0_7, %c0_8] : memref<256x256xbf16, #tpu.memory_space<vmem>>, vector<256x256xbf16>
    %cst_9 = arith.constant dense<0.000000e+00> : vector<8x256xf32>
    %14 = tpu.matmul %12, %13, %cst_9 {dimension_numbers = #tpu.dot_dimension_numbers<[1], [0], [0], [1], [0, 0, 1, 1], [], []>} : vector<8x256xbf16>, vector<256x256xbf16>, vector<8x256xf32> -> vector<8x256xf32>
    %c0_10 = arith.constant 0 : index
    %c0_11 = arith.constant 0 : index
    %15 = vector.load %arg5[%c0_10, %c0_11] : memref<1x256xf32, #tpu.memory_space<vmem>>, vector<1x256xf32>
    %16 = vector.broadcast %15 : vector<1x256xf32> to vector<8x256xf32>
    %17 = arith.addf %14, %16 : vector<8x256xf32>
    %cst_12 = arith.constant 0.000000e+00 : f32
    %18 = vector.broadcast %cst_12 : f32 to vector<8x256xf32>
    %19 = arith.subf %18, %17 : vector<8x256xf32>
    %20 = math.exp %19 : vector<8x256xf32>
    %cst_13 = arith.constant 1.000000e+00 : f32
    %21 = vector.broadcast %cst_13 : f32 to vector<8x256xf32>
    %22 = arith.addf %21, %20 : vector<8x256xf32>
    %23 = tpu.reciprocal %22 {approx = true} : vector<8x256xf32> -> vector<8x256xf32>
    %24 = arith.truncf %23 : vector<8x256xf32> to vector<8x256xbf16>
    %c0_14 = arith.constant 0 : index
    %c0_15 = arith.constant 0 : index
    %25 = vector.load %arg6[%c0_14, %c0_15] : memref<256x256xbf16, #tpu.memory_space<vmem>>, vector<256x256xbf16>
    %cst_16 = arith.constant dense<0.000000e+00> : vector<8x256xf32>
    %26 = tpu.matmul %24, %25, %cst_16 {dimension_numbers = #tpu.dot_dimension_numbers<[1], [0], [0], [1], [0, 0, 1, 1], [], []>} : vector<8x256xbf16>, vector<256x256xbf16>, vector<8x256xf32> -> vector<8x256xf32>
    %c0_17 = arith.constant 0 : index
    %c0_18 = arith.constant 0 : index
    %27 = vector.load %arg7[%c0_17, %c0_18] : memref<1x256xf32, #tpu.memory_space<vmem>>, vector<1x256xf32>
    %28 = vector.broadcast %27 : vector<1x256xf32> to vector<8x256xf32>
    %29 = arith.addf %26, %28 : vector<8x256xf32>
    %cst_19 = arith.constant 0.000000e+00 : f32
    %30 = vector.broadcast %cst_19 : f32 to vector<8x256xf32>
    %31 = arith.subf %30, %29 : vector<8x256xf32>
    %32 = math.exp %31 : vector<8x256xf32>
    %cst_20 = arith.constant 1.000000e+00 : f32
    %33 = vector.broadcast %cst_20 : f32 to vector<8x256xf32>
    %34 = arith.addf %33, %32 : vector<8x256xf32>
    %35 = tpu.reciprocal %34 {approx = true} : vector<8x256xf32> -> vector<8x256xf32>
    %36 = arith.truncf %35 : vector<8x256xf32> to vector<8x256xbf16>
    %c0_21 = arith.constant 0 : index
    %c0_22 = arith.constant 0 : index
    %37 = vector.load %arg8[%c0_21, %c0_22] : memref<256x128xbf16, #tpu.memory_space<vmem>>, vector<256x128xbf16>
    %cst_23 = arith.constant dense<0.000000e+00> : vector<8x128xf32>
    %38 = tpu.matmul %36, %37, %cst_23 {dimension_numbers = #tpu.dot_dimension_numbers<[1], [0], [0], [1], [0, 0, 1, 1], [], []>} : vector<8x256xbf16>, vector<256x128xbf16>, vector<8x128xf32> -> vector<8x128xf32>
    %c0_24 = arith.constant 0 : index
    %c0_25 = arith.constant 0 : index
    %39 = vector.load %arg9[%c0_24, %c0_25] : memref<1x128xf32, #tpu.memory_space<vmem>>, vector<1x128xf32>
    %40 = vector.broadcast %39 : vector<1x128xf32> to vector<8x128xf32>
    %41 = arith.addf %38, %40 : vector<8x128xf32>
    %cst_26 = arith.constant 0.000000e+00 : f32
    %42 = vector.broadcast %cst_26 : f32 to vector<8x128xf32>
    %43 = arith.subf %42, %41 : vector<8x128xf32>
    %44 = math.exp %43 : vector<8x128xf32>
    %cst_27 = arith.constant 1.000000e+00 : f32
    %45 = vector.broadcast %cst_27 : f32 to vector<8x128xf32>
    %46 = arith.addf %45, %44 : vector<8x128xf32>
    %47 = tpu.reciprocal %46 {approx = true} : vector<8x128xf32> -> vector<8x128xf32>
    %48 = arith.truncf %47 : vector<8x128xf32> to vector<8x128xbf16>
    %c0_28 = arith.constant 0 : index
    %c0_29 = arith.constant 0 : index
    %49 = vector.load %arg10[%c0_28, %c0_29] : memref<8x128xbf16, #tpu.memory_space<vmem>>, vector<8x128xbf16>
    tpu.vector_store %arg10[%c0_28, %c0_29], %48 {strides = array<i32>} : memref<8x128xbf16, #tpu.memory_space<vmem>>, vector<8x128xbf16>,
    return
  }
  func.func @transform_0(%arg0: i32) -> (i32, i32) {
    %c0_i32 = arith.constant 0 : i32
    %c0_i32_0 = arith.constant 0 : i32
    return %arg0, %c0_i32 : i32, i32
  }
  func.func @transform_1(%arg0: i32) -> (i32, i32) {
    %c0_i32 = arith.constant 0 : i32
    %c0_i32_0 = arith.constant 0 : i32
    %c0_i32_1 = arith.constant 0 : i32
    return %c0_i32, %c0_i32_0 : i32, i32
  }
  func.func @transform_2(%arg0: i32) -> (i32, i32) {
    %c0_i32 = arith.constant 0 : i32
    %c0_i32_0 = arith.constant 0 : i32
    %c0_i32_1 = arith.constant 0 : i32
    return %c0_i32, %c0_i32_0 : i32, i32
  }
  func.func @transform_3(%arg0: i32) -> (i32, i32) {
    %c0_i32 = arith.constant 0 : i32
    %c0_i32_0 = arith.constant 0 : i32
    %c0_i32_1 = arith.constant 0 : i32
    return %c0_i32, %c0_i32_0 : i32, i32
  }
  func.func @transform_4(%arg0: i32) -> (i32, i32) {
    %c0_i32 = arith.constant 0 : i32
    %c0_i32_0 = arith.constant 0 : i32
    %c0_i32_1 = arith.constant 0 : i32
    return %c0_i32, %c0_i32_0 : i32, i32
  }
  func.func @transform_5(%arg0: i32) -> (i32, i32) {
    %c0_i32 = arith.constant 0 : i32
    %c0_i32_0 = arith.constant 0 : i32
    %c0_i32_1 = arith.constant 0 : i32
    return %c0_i32, %c0_i32_0 : i32, i32
  }
  func.func @transform_6(%arg0: i32) -> (i32, i32) {
    %c0_i32 = arith.constant 0 : i32
    %c0_i32_0 = arith.constant 0 : i32
    %c0_i32_1 = arith.constant 0 : i32
    return %c0_i32, %c0_i32_0 : i32, i32
  }
  func.func @transform_7(%arg0: i32) -> (i32, i32) {
    %c0_i32 = arith.constant 0 : i32
    %c0_i32_0 = arith.constant 0 : i32
    %c0_i32_1 = arith.constant 0 : i32
    return %c0_i32, %c0_i32_0 : i32, i32
  }
  func.func @transform_8(%arg0: i32) -> (i32, i32) {
    %c0_i32 = arith.constant 0 : i32
    %c0_i32_0 = arith.constant 0 : i32
    %c0_i32_1 = arith.constant 0 : i32
    return %c0_i32, %c0_i32_0 : i32, i32
  }
  func.func @transform_9(%arg0: i32) -> (i32, i32) {
    %c0_i32 = arith.constant 0 : i32
    %c0_i32_0 = arith.constant 0 : i32
    return %arg0, %c0_i32 : i32, i32
  }
}

</mosaic_0001>

<bundles_post_ra>
// kernel: mlp_forward.1
= control target key start
LH: loop header
LB: loop body
LE: loop exit
PB: predicated region body
PF: predicated region fallthrough
CT: control target
= control target key end

     0   :  { %14 = vsyncpa [#allocation3], 0  ;;  %s2311_s0 = inlined_call_operand.vmem [shape: bf16[8,784], index: 0, kind: input, shape index: {}]   ;;  %s2312_s1 = inlined_call_operand.hbm [shape: bf16[784,256], index: 1, kind: input, shape index: {}]   ;;  %s2313_s2 = inlined_call_operand.vmem [shape: f32[1,256], index: 2, kind: input, shape index: {}]   ;;  %s2314_s3 = inlined_call_operand.hbm [shape: bf16[256,256], index: 3, kind: input, shape index: {}]   ;;  %s2315_s4 = inlined_call_operand.vmem [shape: f32[1,256], index: 4, kind: input, shape index: {}]   ;;  %s2316_s5 = inlined_call_operand.hbm [shape: bf16[256,256], index: 5, kind: input, shape index: {}]   ;;  %s2317_s6 = inlined_call_operand.vmem [shape: f32[1,256], index: 6, kind: input, shape index: {}]   ;;  %s2318_s7 = inlined_call_operand.hbm [shape: bf16[256,128], index: 7, kind: input, shape index: {}]   ;;  %s2319_s8 = inlined_call_operand.vmem [shape: f32[1,128], index: 8, kind: input, shape index: {}]   ;;  %s2320_s9 = inlined_call_operand.vmem [shape: bf16[8,128], index: 9, kind: output, shape index: {}]  }
   0x1   :  { %15 = vsyncpa [#allocation5], 0 }
   0x2   :  { %16 = vsyncpa [#allocation8], 0  ;;  %s2197_s30 = smov [#allocation4]   ;;  %s2198_s11 = smov [#allocation2]  }
   0x3   :  { %s38_s10 = sshll.u32 %s2197_s30, 4  ;;  %s24_s12 = sshll.u32 %s2198_s11, 4  ;;  %s39_s10 = int_to_ptr.vmem [resolvable:$true] %s38_s10  ;;  %s25_s12 = int_to_ptr.vmem [resolvable:$true] %s24_s12 }
   0x4   :  { %s2119_s13 = scalar_lea.vmem %s39_s10, 4096  ;;  %p2124_p1 = scmp.lt.s32.totalorder %s39_s10, %s39_s10 }
   0x5   :  { %p2120_p0 = scmp.ne.s32.totalorder %s39_s10, %s2119_s13  ;;  %p2125_p2 = scmp.lt.s32.totalorder %s2119_s13, %s2119_s13 }
   0x7   :  { %p2126_p3 = por %p2125_p2, %p2124_p1 }
   0x9   :  { %p2127_p4 = pnand %p2126_p3, %p2120_p0 }
   0xb   :  { %2130 = shalt.err (!%p2127_p4)
}
   0xc   :  { %s2199_s14 = smov 128   ;;  %s2200_s15 = smov 8  }
   0xd   :  { %44 = dma.hbm_to_vmem [thread:$0]  %s2314_s3, 4096, %s39_s10, [#allocation5], %s2199_s14, %s2199_s14, %s2200_s15  }
   0xe   :  { %s2139_s18 = scalar_lea.vmem %s25_s12, 12544  ;;  %p2144_p6 = scmp.lt.s32.totalorder %s25_s12, %s25_s12 }
   0xf   :  { %p2140_p5 = scmp.ne.s32.totalorder %s25_s12, %s2139_s18  ;;  %p2145_p7 = scmp.lt.s32.totalorder %s2139_s18, %s2139_s18 }
  0x11   :  { %p2146_p8 = por %p2145_p7, %p2144_p6 }
  0x13   :  { %p2147_p9 = pnand %p2146_p8, %p2140_p5 }
  0x15   :  { %2150 = shalt.err (!%p2147_p9)
}
  0x16   :  { %30 = dma.hbm_to_vmem [thread:$0]  %s2312_s1, 12544, %s25_s12, [#allocation3], %s2199_s14, %s2199_s14, %s2200_s15  }
  0x17   :  { %s2201_s21 = smov [#allocation6]   ;;  %s2202_s23 = smov [#allocation7]  }
  0x18   :  { %s52_s22 = sshll.u32 %s2201_s21, 4  ;;  %s66_s24 = sshll.u32 %s2202_s23, 4  ;;  %s53_s22 = int_to_ptr.vmem [resolvable:$true] %s52_s22  ;;  %s67_s24 = int_to_ptr.vmem [resolvable:$true] %s66_s24 }
  0x19   :  { %s2159_s25 = scalar_lea.vmem %s53_s22, 4096  ;;  %p2164_p11 = scmp.lt.s32.totalorder %s53_s22, %s53_s22 }
  0x1a   :  { %p2160_p10 = scmp.ne.s32.totalorder %s53_s22, %s2159_s25  ;;  %p2165_p12 = scmp.lt.s32.totalorder %s2159_s25, %s2159_s25 }
  0x1c   :  { %p2166_p13 = por %p2165_p12, %p2164_p11 }
  0x1e   :  { %p2167_p0 = pnand %p2166_p13, %p2160_p10 }
  0x20   :  { %2170 = shalt.err (!%p2167_p0)
}
  0x21   :  { %58 = dma.hbm_to_vmem [thread:$0]  %s2316_s5, 4096, %s53_s22, [#allocation5], %s2199_s14, %s2199_s14, %s2200_s15  }
  0x22   :  { %s2179_s27 = scalar_lea.vmem %s67_s24, 2048  ;;  %p2184_p2 = scmp.lt.s32.totalorder %s67_s24, %s67_s24 }
  0x23   :  { %p2180_p1 = scmp.ne.s32.totalorder %s67_s24, %s2179_s27  ;;  %p2185_p3 = scmp.lt.s32.totalorder %s2179_s27, %s2179_s27 }
  0x25   :  { %p2186_p4 = por %p2185_p3, %p2184_p2 }
  0x27   :  { %p2187_p5 = pnand %p2186_p4, %p2180_p1 }
  0x29   :  { %2190 = shalt.err (!%p2187_p5)
}
  0x2a   :  { %s2203_s1 = smov 64   ;;  %s2204_s28 = smov 4  }
  0x2b   :  { %72 = dma.hbm_to_vmem [thread:$0]  %s2318_s7, 2048, %s67_s24, [#allocation8], %s2203_s1, %s2203_s1, %s2204_s28  }
  0x2c   :  { %2191 = dma.done.wait [#allocation3], 12544  }
  0x2d   :  { %2192 = vsyncadd [#allocation3], 4294954752 }
  0x2e   :  { %2193 = dma.done.wait [#allocation5], 8192  }
  0x2f   :  { %2194 = vsyncadd [#allocation5], 4294959104 }
  0x30   :  { %2195 = dma.done.wait [#allocation8], 2048  }
  0x31   :  { %2196 = vsyncadd [#allocation8], 4294965248  ;;  %v1817_v0 = vld [vmem:[#allocation2 + $0x74] ss:$8 sps:$4 sm:$0xff]   ;;  %v1819_v1 = vld [vmem:[#allocation2 + $0x70] ss:$8 sps:$4 sm:$0xff]  }
  0x32   :  { %720 = vmatprep.subr.bf16.mxu0 %v1817_v0  ;;  %v1820_v2 = vld [vmem:[#allocation2 + $0x174] ss:$8 sps:$4 sm:$0xff]   ;;  %v1822_v3 = vld [vmem:[#allocation2 + $0x170] ss:$8 sps:$4 sm:$0xff]   ;;  %v1823_v4 = vld [vmem:[#allocation2 + $0x64] ss:$8 sps:$4 sm:$0xff]  }
  0x33   :  { %721 = vmatpush1.bf16.msra.mxu0 %v1819_v1  ;;  %v1825_v5 = vld [vmem:[#allocation2 + $0x60] ss:$8 sps:$4 sm:$0xff]   ;;  %761 = vmatprep.subr.bf16.mxu1 %v1820_v2  ;;  %v1826_v6 = vld [vmem:[#allocation2 + $0x164] ss:$8 sps:$4 sm:$0xff]   ;;  %v1829_v8 = vld [vmem:[#allocation2 + $0x54] ss:$8 sps:$4 sm:$0xff]  }
  0x34   :  { %762 = vmatpush1.bf16.msra.mxu1 %v1822_v3  ;;  %722 = vmatprep.subr.bf16.mxu0 %v1823_v4  ;;  %v1828_v7 = vld [vmem:[#allocation2 + $0x160] ss:$8 sps:$4 sm:$0xff]   ;;  %v1831_v9 = vld [vmem:[#allocation2 + $0x50] ss:$8 sps:$4 sm:$0xff]   ;;  %v1832_v10 = vld [vmem:[#allocation2 + $0x154] ss:$8 sps:$4 sm:$0xff]  }
  0x35   :  { %763 = vmatprep.subr.bf16.mxu1 %v1826_v6  ;;  %v1835_v11 = vld [vmem:[#allocation2 + $0x44] ss:$8 sps:$4 sm:$0xff]   ;;  %v1834_v12 = vld [vmem:[#allocation2 + $0x150] ss:$8 sps:$4 sm:$0xff]   ;;  %v1837_v14 = vld [vmem:[#allocation2 + $0x40] ss:$8 sps:$4 sm:$0xff]  }
  0x36   :  { %v1838_v13 = vld [vmem:[#allocation2 + $0x144] ss:$8 sps:$4 sm:$0xff]   ;;  %v1841_v15 = vld [vmem:[#allocation2 + $0x34] ss:$8 sps:$4 sm:$0xff]   ;;  %v1840_v16 = vld [vmem:[#allocation2 + $0x140] ss:$8 sps:$4 sm:$0xff]  }
  0x37   :  { %723 = vmatpush1.bf16.msra.mxu0 %v1825_v5  ;;  %v1844_v17 = vld [vmem:[#allocation2 + $0x134] ss:$8 sps:$4 sm:$0xff]   ;;  %v1843_v18 = vld [vmem:[#allocation2 + $0x30] ss:$8 sps:$4 sm:$0xff]   ;;  %v1847_v19 = vld [vmem:[#allocation2 + $0x24] ss:$8 sps:$4 sm:$0xff]  }
  0x38   :  { %724 = vmatprep.subr.bf16.mxu0 %v1829_v8  ;;  %764 = vmatpush1.bf16.msra.mxu1 %v1828_v7  ;;  %v1846_v20 = vld [vmem:[#allocation2 + $0x130] ss:$8 sps:$4 sm:$0xff]   ;;  %v1850_v21 = vld [vmem:[#allocation2 + $0x124] ss:$8 sps:$4 sm:$0xff]   ;;  %v1849_v22 = vld [vmem:[#allocation2 + $0x20] ss:$8 sps:$4 sm:$0xff]  }
  0x39   :  { %765 = vmatprep.subr.bf16.mxu1 %v1832_v10  ;;  %v1853_v23 = vld [vmem:[#allocation2 + $0x14] ss:$8 sps:$4 sm:$0xff]   ;;  %v1852_v24 = vld [vmem:[#allocation2 + $0x120] ss:$8 sps:$4 sm:$0xff]   ;;  %v1855_v26 = vld [vmem:[#allocation2 + $0x10] ss:$8 sps:$4 sm:$0xff]  }
  0x3a   :  { %v1856_v25 = vld [vmem:[#allocation2 + $0x114] ss:$8 sps:$4 sm:$0xff]   ;;  %v1859_v27 = vld [vmem:[#allocation2 + $0x4] ss:$8 sps:$4 sm:$0xff]   ;;  %v1858_v28 = vld [vmem:[#allocation2 + $0x110] ss:$8 sps:$4 sm:$0xff]  }
  0x3b   :  { %725 = vmatpush1.bf16.msra.mxu0 %v1831_v9  ;;  %v1862_v29 = vld [vmem:[#allocation2 + $0x104] ss:$8 sps:$4 sm:$0xff]   ;;  %v1861_v30 = vld [vmem:[#allocation2] ss:$8 sps:$4 sm:$0xff]   ;;  %v1865_v31 = vld [vmem:[#allocation2 + $0xf4] ss:$8 sps:$4 sm:$0xff]  }
  0x3c   :  { %726 = vmatprep.subr.bf16.mxu0 %v1835_v11  ;;  %766 = vmatpush1.bf16.msra.mxu1 %v1834_v12  ;;  %v1864_v32 = vld [vmem:[#allocation2 + $0x100] ss:$8 sps:$4 sm:$0xff]   ;;  %v1868_v33 = vld [vmem:[#allocation2 + $0x1f4] ss:$8 sps:$4 sm:$0xff]   ;;  %v1867_v34 = vld [vmem:[#allocation2 + $0xf0] ss:$8 sps:$4 sm:$0xff]  }
  0x3d   :  { %767 = vmatprep.subr.bf16.mxu1 %v1838_v13  ;;  %v1871_v35 = vld [vmem:[#allocation2 + $0xe4] ss:$8 sps:$4 sm:$0xff]   ;;  %v1870_v36 = vld [vmem:[#allocation2 + $0x1f0] ss:$8 sps:$4 sm:$0xff]   ;;  %v1873_v38 = vld [vmem:[#allocation2 + $0xe0] ss:$8 sps:$4 sm:$0xff]  }
  0x3e   :  { %v1874_v37 = vld [vmem:[#allocation2 + $0x1e4] ss:$8 sps:$4 sm:$0xff]   ;;  %v1877_v39 = vld [vmem:[#allocation2 + $0xd4] ss:$8 sps:$4 sm:$0xff]   ;;  %v1876_v40 = vld [vmem:[#allocation2 + $0x1e0] ss:$8 sps:$4 sm:$0xff]  }
  0x3f   :  { %727 = vmatpush1.bf16.msra.mxu0 %v1837_v14  ;;  %v1880_v41 = vld [vmem:[#allocation2 + $0x1d4] ss:$8 sps:$4 sm:$0xff]   ;;  %v1879_v42 = vld [vmem:[#allocation2 + $0xd0] ss:$8 sps:$4 sm:$0xff]   ;;  %v1883_v43 = vld [vmem:[#allocation2 + $0xc4] ss:$8 sps:$4 sm:$0xff]  }
  0x40   :  { %728 = vmatprep.subr.bf16.mxu0 %v1841_v15  ;;  %768 = vmatpush1.bf16.msra.mxu1 %v1840_v16  ;;  %v1882_v44 = vld [vmem:[#allocation2 + $0x1d0] ss:$8 sps:$4 sm:$0xff]   ;;  %v1886_v45 = vld [vmem:[#allocation2 + $0x1c4] ss:$8 sps:$4 sm:$0xff]   ;;  %v1885_v47 = vld [vmem:[#allocation2 + $0xc0] ss:$8 sps:$4 sm:$0xff]  }
  0x41   :  { %769 = vmatprep.subr.bf16.mxu1 %v1844_v17  ;;  %v88_v46 = vld [vmem:[%s2311_s0] sm:$0xff]  ;;  %v1889_v49 = vld [vmem:[#allocation2 + $0xb4] ss:$8 sps:$4 sm:$0xff]   ;;  %v89_v50 = vld [vmem:[%s2311_s0 + $0x8] sm:$0xff]  ;;  %v2205_v16 = vmov 0   ;;  %vm716_vm0 = vcmask 130048  }
  0x42   :  { %v1600_v48 = vcombine.high %v88_v46, %v88_v46  ;;  %v1888_v51 = vld [vmem:[#allocation2 + $0x1c0] ss:$8 sps:$4 sm:$0xff]   ;;  %v1602_v52 = vcombine.high %v89_v50, %v89_v50  ;;  %v1892_v53 = vld [vmem:[#allocation2 + $0x1b4] ss:$8 sps:$4 sm:$0xff]   ;;  %v1891_v54 = vld [vmem:[#allocation2 + $0xb0] ss:$8 sps:$4 sm:$0xff]   ;;  %v1599_v5 = vcombine.low %v88_v46, %v88_v46  ;;  %v1601_v7 = vcombine.low %v89_v50, %v89_v50 }
  0x43   :  { %729 = vmatpush1.bf16.msra.mxu0 %v1843_v18  ;;  %v1895_v55 = vld [vmem:[#allocation2 + $0xa4] ss:$8 sps:$4 sm:$0xff]   ;;  %v1894_v56 = vld [vmem:[#allocation2 + $0x1b0] ss:$8 sps:$4 sm:$0xff]   ;;  %v1897_v58 = vld [vmem:[#allocation2 + $0xa0] ss:$8 sps:$4 sm:$0xff]  }
  0x44   :  { %730 = vmatprep.subr.bf16.mxu0 %v1847_v19  ;;  %770 = vmatpush1.bf16.msra.mxu1 %v1846_v20  ;;  %v1898_v57 = vld [vmem:[#allocation2 + $0x1a4] ss:$8 sps:$4 sm:$0xff]   ;;  %v1901_v59 = vld [vmem:[#allocation2 + $0x94] ss:$8 sps:$4 sm:$0xff]   ;;  %v1900_v60 = vld [vmem:[#allocation2 + $0x1a0] ss:$8 sps:$4 sm:$0xff]  }
  0x45   :  { %771 = vmatprep.subr.bf16.mxu1 %v1850_v21  ;;  %752 = vmatprep.mubr.bf16.mxu0 %v1600_v48  ;;  %v1904_v61 = vld [vmem:[#allocation2 + $0x194] ss:$8 sps:$4 sm:$0xff]   ;;  %v1903_v62 = vld [vmem:[#allocation2 + $0x90] ss:$8 sps:$4 sm:$0xff]   ;;  %v1907_v63 = vld [vmem:[#allocation2 + $0x84] ss:$8 sps:$4 sm:$0xff]  }
  0x46   :  { %793 = vmatprep.mubr.bf16.mxu1 %v1602_v52  ;;  %v1906_v0 = vld [vmem:[#allocation2 + $0x190] ss:$8 sps:$4 sm:$0xff]   ;;  %v1910_v1 = vld [vmem:[#allocation2 + $0x184] ss:$8 sps:$4 sm:$0xff]   ;;  %v1909_v2 = vld [vmem:[#allocation2 + $0x80] ss:$8 sps:$4 sm:$0xff]  }
  0x47   :  { %731 = vmatpush1.bf16.msra.mxu0 %v1849_v22  ;;  %v1917_v3 = vld [vmem:[#allocation2 + $0x274] ss:$8 sps:$4 sm:$0xff]   ;;  %v1914_v4 = vld [vmem:[#allocation2 + $0x180] ss:$8 sps:$4 sm:$0xff]   ;;  %v1915_v6 = vld [vmem:[#allocation2 + $0x270] ss:$8 sps:$4 sm:$0xff]  }
  0x48   :  { %732 = vmatprep.subr.bf16.mxu0 %v1853_v23  ;;  %772 = vmatpush1.bf16.msra.mxu1 %v1852_v24  ;;  %v1922_v8 = vld [vmem:[#allocation2 + $0x264] ss:$8 sps:$4 sm:$0xff]   ;;  %v1962_v10 = vld [vmem:[#allocation2 + $0x300] ss:$8 sps:$4 sm:$0xff]   ;;  %v2277_v12 = vld [vmem:[%s2311_s0 + $0x10] sm:$0xff] }
  0x49   :  { %773 = vmatprep.subr.bf16.mxu1 %v1856_v25  ;;  %v1964_v9 = vld [vmem:[#allocation2 + $0x304] ss:$8 sps:$4 sm:$0xff]   ;;  %v1920_v11 = vld [vmem:[#allocation2 + $0x260] ss:$8 sps:$4 sm:$0xff]   ;;  %v1925_v13 = vld [vmem:[#allocation2 + $0x254] ss:$8 sps:$4 sm:$0xff]   ;;  %v1604_v14 = vcombine.high %v2277_v12, %v2277_v12 }
  0x4a   :  { %v1923_v15 = vld [vmem:[#allocation2 + $0x250] ss:$8 sps:$4 sm:$0xff]   ;;  %v1928_v17 = vld [vmem:[#allocation2 + $0x244] ss:$8 sps:$4 sm:$0xff]   ;;  %v1926_v19 = vld [vmem:[#allocation2 + $0x240] ss:$8 sps:$4 sm:$0xff]  }
  0x4b   :  { %733 = vmatpush1.bf16.msra.mxu0 %v1855_v26  ;;  %v1968_v18 = vld [vmem:[%s2311_s0 + $0x18] ss:$0 sps:$4 sm:$0xff]   ;;  %v1931_v20 = vld [vmem:[#allocation2 + $0x234] ss:$8 sps:$4 sm:$0xff]   ;;  %v1934_v22 = vld [vmem:[#allocation2 + $0x224] ss:$8 sps:$4 sm:$0xff]  }
  0x4c   :  { %734 = vmatprep.subr.bf16.mxu0 %v1859_v27  ;;  %774 = vmatpush1.bf16.msra.mxu1 %v1858_v28  ;;  %v1929_v21 = vld [vmem:[#allocation2 + $0x230] ss:$8 sps:$4 sm:$0xff]   ;;  %v1932_v23 = vld [vmem:[#allocation2 + $0x220] ss:$8 sps:$4 sm:$0xff]   ;;  %v1937_v24 = vld [vmem:[#allocation2 + $0x214] ss:$8 sps:$4 sm:$0xff]  }
  0x4d   :  { %775 = vmatprep.subr.bf16.mxu1 %v1862_v29  ;;  %v1935_v25 = vld [vmem:[#allocation2 + $0x210] ss:$8 sps:$4 sm:$0xff]   ;;  %v1940_v26 = vld [vmem:[#allocation2 + $0x204] ss:$8 sps:$4 sm:$0xff]   ;;  %v1938_v27 = vld [vmem:[#allocation2 + $0x200] ss:$8 sps:$4 sm:$0xff]  }
  0x4e   :  { %v1943_v28 = vld [vmem:[#allocation2 + $0x2f4] ss:$8 sps:$4 sm:$0xff]   ;;  %v1941_v29 = vld [vmem:[#allocation2 + $0x2f0] ss:$8 sps:$4 sm:$0xff]   ;;  %v1973_v46 = vld [vmem:[#allocation4 + $0x74] ss:$8 sps:$4 sm:$0xff]  }
  0x4f   :  { %735 = vmatpush1.bf16.msra.mxu0 %v1861_v30  ;;  %v1946_v30 = vld [vmem:[#allocation2 + $0x2e4] ss:$8 sps:$4 sm:$0xff]   ;;  %v1974_v48 = vld [vmem:[#allocation4 + $0x60] ss:$8 sps:$4 sm:$0xff]   ;;  %v1977_v50 = vld [vmem:[#allocation4 + $0x50] ss:$8 sps:$4 sm:$0xff]  }
  0x50   :  { %736 = vmatprep.subr.bf16.mxu0 %v1865_v31  ;;  %776 = vmatpush1.bf16.msra.mxu1 %v1864_v32  ;;  %v1944_v31 = vld [vmem:[#allocation2 + $0x2e0] ss:$8 sps:$4 sm:$0xff]   ;;  %v1949_v32 = vld [vmem:[#allocation2 + $0x2d4] ss:$8 sps:$4 sm:$0xff]   ;;  %v1980_v52 = vld [vmem:[#allocation4 + $0x40] ss:$8 sps:$4 sm:$0xff]  }
  0x51   :  { %777 = vmatprep.subr.bf16.mxu1 %v1868_v33  ;;  %v1947_v33 = vld [vmem:[#allocation2 + $0x2d0] ss:$8 sps:$4 sm:$0xff]  }
  0x53   :  { %737 = vmatpush2.bf16.msra.mxu0 %v1867_v34  ;;  %v1952_v34 = vld [vmem:[#allocation2 + $0x2c4] ss:$8 sps:$4 sm:$0xff]  }
  0x54   :  { %738 = vmatprep.subr.bf16.mxu0 %v1871_v35  ;;  %778 = vmatpush2.bf16.msra.mxu1 %v1870_v36  ;;  %v1950_v35 = vld [vmem:[#allocation2 + $0x2c0] ss:$8 sps:$4 sm:$0xff]   ;;  %v1955_v36 = vld [vmem:[#allocation2 + $0x2b4] ss:$8 sps:$4 sm:$0xff]  }
  0x55   :  { %779 = vmatprep.subr.bf16.mxu1 %v1874_v37  ;;  %v1953_v37 = vld [vmem:[#allocation2 + $0x2b0] ss:$8 sps:$4 sm:$0xff]  }
  0x57   :  { %739 = vmatpush2.bf16.msra.mxu0 %v1873_v38  ;;  %v1958_v38 = vld [vmem:[#allocation2 + $0x2a4] ss:$8 sps:$4 sm:$0xff]  }
  0x58   :  { %740 = vmatprep.subr.bf16.mxu0 %v1877_v39  ;;  %780 = vmatpush2.bf16.msra.mxu1 %v1876_v40  ;;  %v1956_v39 = vld [vmem:[#allocation2 + $0x2a0] ss:$8 sps:$4 sm:$0xff]   ;;  %v1961_v40 = vld [vmem:[#allocation2 + $0x294] ss:$8 sps:$4 sm:$0xff]  }
  0x59   :  { %781 = vmatprep.subr.bf16.mxu1 %v1880_v41  ;;  %v1959_v41 = vld [vmem:[#allocation2 + $0x290] ss:$8 sps:$4 sm:$0xff]  }
  0x5b   :  { %741 = vmatpush2.bf16.msra.mxu0 %v1879_v42  ;;  %v1967_v42 = vld [vmem:[#allocation2 + $0x284] ss:$8 sps:$4 sm:$0xff]  }
  0x5c   :  { %742 = vmatprep.subr.bf16.mxu0 %v1883_v43  ;;  %782 = vmatpush2.bf16.msra.mxu1 %v1882_v44  ;;  %v1965_v43 = vld [vmem:[#allocation2 + $0x280] ss:$8 sps:$4 sm:$0xff]   ;;  %v1603_v44 = vcombine.low %v2277_v12, %v2277_v12  ;;  %v2016_v12 = vld [vmem:[#allocation4 + $0x80] ss:$8 sps:$4 sm:$0xff]  }
  0x5d   :  { %783 = vmatprep.subr.bf16.mxu1 %v1886_v45  ;;  %v1971_v45 = vld [vmem:[#allocation4 + $0x70] ss:$8 sps:$4 sm:$0xff]  }
  0x5f   :  { %743 = vmatpush2.bf16.msra.mxu0 %v1885_v47  ;;  %v1976_v47 = vld [vmem:[#allocation4 + $0x64] ss:$8 sps:$4 sm:$0xff]  }
  0x60   :  { %744 = vmatprep.subr.bf16.mxu0 %v1889_v49  ;;  %784 = vmatpush2.bf16.msra.mxu1 %v1888_v51  ;;  %v1979_v49 = vld [vmem:[#allocation4 + $0x54] ss:$8 sps:$4 sm:$0xff]   ;;  %v1982_v51 = vld [vmem:[#allocation4 + $0x44] ss:$8 sps:$4 sm:$0xff]  }
  0x61   :  { %785 = vmatprep.subr.bf16.mxu1 %v1892_v53  ;;  %v1985_v53 = vld [vmem:[#allocation4 + $0x34] ss:$8 sps:$4 sm:$0xff]  }
  0x63   :  { %745 = vmatpush2.bf16.msra.mxu0 %v1891_v54  ;;  %v1983_v54 = vld [vmem:[#allocation4 + $0x30] ss:$8 sps:$4 sm:$0xff]  }
  0x64   :  { %746 = vmatprep.subr.bf16.mxu0 %v1895_v55  ;;  %786 = vmatpush2.bf16.msra.mxu1 %v1894_v56  ;;  %v1988_v55 = vld [vmem:[#allocation4 + $0x24] ss:$8 sps:$4 sm:$0xff]   ;;  %v1986_v56 = vld [vmem:[#allocation4 + $0x20] ss:$8 sps:$4 sm:$0xff]  }
  0x65   :  { %787 = vmatprep.subr.bf16.mxu1 %v1898_v57  ;;  %v1991_v57 = vld [vmem:[#allocation4 + $0x14] ss:$8 sps:$4 sm:$0xff]  }
  0x67   :  { %747 = vmatpush2.bf16.msra.mxu0 %v1897_v58  ;;  %v1989_v58 = vld [vmem:[#allocation4 + $0x10] ss:$8 sps:$4 sm:$0xff]  }
  0x68   :  { %748 = vmatprep.subr.bf16.mxu0 %v1901_v59  ;;  %788 = vmatpush2.bf16.msra.mxu1 %v1900_v60  ;;  %v1994_v59 = vld [vmem:[#allocation4 + $0x4] ss:$8 sps:$4 sm:$0xff]   ;;  %v1992_v60 = vld [vmem:[#allocation4] ss:$8 sps:$4 sm:$0xff]  }
  0x69   :  { %789 = vmatprep.subr.bf16.mxu1 %v1904_v61  ;;  %v1997_v61 = vld [vmem:[#allocation4 + $0xf4] ss:$8 sps:$4 sm:$0xff]  }
  0x6b   :  { %749 = vmatpush2.bf16.msra.mxu0 %v1903_v62  ;;  %v1995_v62 = vld [vmem:[#allocation4 + $0xf0] ss:$8 sps:$4 sm:$0xff]  }
  0x6c   :  { %750 = vmatprep.subr.bf16.mxu0 %v1907_v63  ;;  %790 = vmatpush2.bf16.msra.mxu1 %v1906_v0  ;;  %v2000_v63 = vld [vmem:[#allocation4 + $0xe4] ss:$8 sps:$4 sm:$0xff]   ;;  %v1998_v0 = vld [vmem:[#allocation4 + $0xe0] ss:$8 sps:$4 sm:$0xff]  }
  0x6d   :  { %791 = vmatprep.subr.bf16.mxu1 %v1910_v1  ;;  %v2003_v1 = vld [vmem:[#allocation4 + $0xd4] ss:$8 sps:$4 sm:$0xff]  }
  0x6f   :  { %751 = vmatpush2.bf16.msra.mxu0 %v1909_v2  ;;  %v2001_v2 = vld [vmem:[#allocation4 + $0xd0] ss:$8 sps:$4 sm:$0xff]  }
  0x70   :  { %802 = vmatprep.subr.bf16.mxu0 %v1917_v3  ;;  %792 = vmatpush2.bf16.msra.mxu1 %v1914_v4  ;;  %v2006_v3 = vld [vmem:[#allocation4 + $0xc4] ss:$8 sps:$4 sm:$0xff]   ;;  %v2004_v4 = vld [vmem:[#allocation4 + $0xc0] ss:$8 sps:$4 sm:$0xff]  }
  0x71   :  { %857 = vmatprep.subr.bf16.mxu1 %v1964_v9  ;;  %v2015_v9 = vld [vmem:[#allocation4 + $0x94] ss:$8 sps:$4 sm:$0xff]  }
  0x72   :  { %753 = vmatmul.mubr.bf16.vlgmr.msra.gmra.mxu0 %v1599_v5  ;;  %v2007_v5 = vld [vmem:[#allocation4 + $0xb0] ss:$8 sps:$4 sm:$0xff]  }
  0x73   :  { %803 = vmatpush1.bf16.msra.mxu0 %v1915_v6  ;;  %794 = vmatmul.mubr.bf16.vlgmr.msra.gmra.mxu1 %v1601_v7  ;;  %v2009_v6 = vld [vmem:[#allocation4 + $0xb4] ss:$8 sps:$4 sm:$0xff]   ;;  %v2012_v7 = vld [vmem:[#allocation4 + $0xa4] ss:$8 sps:$4 sm:$0xff]  }
  0x74   :  { %804 = vmatprep.subr.bf16.mxu0 %v1922_v8  ;;  %858 = vmatpush1.bf16.msra.mxu1 %v1962_v10  ;;  %v2010_v8 = vld [vmem:[#allocation4 + $0xa0] ss:$8 sps:$4 sm:$0xff]   ;;  %v2013_v10 = vld [vmem:[#allocation4 + $0x90] ss:$8 sps:$4 sm:$0xff]  }
  0x75   :  { %875 = vmatprep.mubr.bf16.mxu1 %v2205_v16  ;;  %834 = vmatprep.mubr.bf16.mxu0 %v1604_v14  ;;  %v2021_v14 = vld [vmem:[#allocation6 + $0x74] ss:$8 sps:$4 sm:$0xff]   ;;  %v2022_v16 = vld [vmem:[#allocation6 + $0x60] ss:$8 sps:$4 sm:$0xff]  }
  0x76   :  { %1100 = vmatprep.subr.bf16.mxu1 %v1973_v46 }
  0x77   :  { %805 = vmatpush1.bf16.msra.mxu0 %v1920_v11  ;;  %v2018_v11 = vld [vmem:[#allocation4 + $0x84] ss:$8 sps:$4 sm:$0xff]  }
  0x78   :  { %806 = vmatprep.subr.bf16.mxu0 %v1925_v13  ;;  %v2019_v13 = vld [vmem:[#allocation6 + $0x70] ss:$8 sps:$4 sm:$0xff]  }
  0x7b   :  { %807 = vmatpush1.bf16.msra.mxu0 %v1923_v15  ;;  %1704 = vmatmul.mubr.msk.bf16.vlgmr.msra.gmra.mxu1 %vm716_vm0, %v1968_v18  ;;  %v2024_v15 = vld [vmem:[#allocation6 + $0x64] ss:$8 sps:$4 sm:$0xff]   ;;  %v2025_v18 = vld [vmem:[#allocation6 + $0x50] ss:$8 sps:$4 sm:$0xff]  }
  0x7c   :  { %808 = vmatprep.subr.bf16.mxu0 %v1928_v17  ;;  %1101 = vmatpush1.bf16.msra.mxu1 %v1971_v45  ;;  %v2027_v17 = vld [vmem:[#allocation6 + $0x54] ss:$8 sps:$4 sm:$0xff]  }
  0x7d   :  { %1102 = vmatprep.subr.bf16.mxu1 %v1976_v47 }
  0x7f   :  { %809 = vmatpush1.bf16.msra.mxu0 %v1926_v19  ;;  %v2030_v19 = vld [vmem:[#allocation6 + $0x44] ss:$8 sps:$4 sm:$0xff]  }
  0x80   :  { %810 = vmatprep.subr.bf16.mxu0 %v1931_v20  ;;  %1103 = vmatpush1.bf16.msra.mxu1 %v1974_v48  ;;  %v2028_v20 = vld [vmem:[#allocation6 + $0x40] ss:$8 sps:$4 sm:$0xff]  }
  0x81   :  { %1104 = vmatprep.subr.bf16.mxu1 %v1979_v49 }
  0x83   :  { %811 = vmatpush1.bf16.msra.mxu0 %v1929_v21  ;;  %v2033_v21 = vld [vmem:[#allocation6 + $0x34] ss:$8 sps:$4 sm:$0xff]  }
  0x84   :  { %812 = vmatprep.subr.bf16.mxu0 %v1934_v22  ;;  %1105 = vmatpush1.bf16.msra.mxu1 %v1977_v50  ;;  %v2031_v22 = vld [vmem:[#allocation6 + $0x30] ss:$8 sps:$4 sm:$0xff]  }
  0x85   :  { %1106 = vmatprep.subr.bf16.mxu1 %v1982_v51 }
  0x87   :  { %813 = vmatpush1.bf16.msra.mxu0 %v1932_v23  ;;  %v2036_v23 = vld [vmem:[#allocation6 + $0x24] ss:$8 sps:$4 sm:$0xff]  }
  0x88   :  { %814 = vmatprep.subr.bf16.mxu0 %v1937_v24  ;;  %1107 = vmatpush1.bf16.msra.mxu1 %v1980_v52  ;;  %v2034_v24 = vld [vmem:[#allocation6 + $0x20] ss:$8 sps:$4 sm:$0xff]  }
  0x89   :  { %1108 = vmatprep.subr.bf16.mxu1 %v1985_v53 }
  0x8b   :  { %815 = vmatpush1.bf16.msra.mxu0 %v1935_v25 }
  0x8c   :  { %816 = vmatprep.subr.bf16.mxu0 %v1940_v26  ;;  %1109 = vmatpush1.bf16.msra.mxu1 %v1983_v54 }
  0x8d   :  { %1110 = vmatprep.subr.bf16.mxu1 %v1988_v55 }
  0x8f   :  { %817 = vmatpush1.bf16.msra.mxu0 %v1938_v27 }
  0x90   :  { %818 = vmatprep.subr.bf16.mxu0 %v1943_v28  ;;  %1111 = vmatpush1.bf16.msra.mxu1 %v1986_v56 }
  0x91   :  { %1112 = vmatprep.subr.bf16.mxu1 %v1991_v57 }
  0x93   :  { %819 = vmatpush2.bf16.msra.mxu0 %v1941_v29 }
  0x94   :  { %820 = vmatprep.subr.bf16.mxu0 %v1946_v30  ;;  %1113 = vmatpush1.bf16.msra.mxu1 %v1989_v58 }
  0x95   :  { %1114 = vmatprep.subr.bf16.mxu1 %v1994_v59 }
  0x97   :  { %821 = vmatpush2.bf16.msra.mxu0 %v1944_v31 }
  0x98   :  { %822 = vmatprep.subr.bf16.mxu0 %v1949_v32  ;;  %1115 = vmatpush1.bf16.msra.mxu1 %v1992_v60 }
  0x99   :  { %1116 = vmatprep.subr.bf16.mxu1 %v1997_v61 }
  0x9b   :  { %823 = vmatpush2.bf16.msra.mxu0 %v1947_v33 }
  0x9c   :  { %824 = vmatprep.subr.bf16.mxu0 %v1952_v34  ;;  %1117 = vmatpush2.bf16.msra.mxu1 %v1995_v62 }
  0x9d   :  { %1118 = vmatprep.subr.bf16.mxu1 %v2000_v63 }
  0x9f   :  { %825 = vmatpush2.bf16.msra.mxu0 %v1950_v35 }
  0xa0   :  { %826 = vmatprep.subr.bf16.mxu0 %v1955_v36  ;;  %1119 = vmatpush2.bf16.msra.mxu1 %v1998_v0 }
  0xa1   :  { %1120 = vmatprep.subr.bf16.mxu1 %v2003_v1 }
  0xa3   :  { %827 = vmatpush2.bf16.msra.mxu0 %v1953_v37  ;;  %v192_v37 = vlaneseq }
  0xa4   :  { %828 = vmatprep.subr.bf16.mxu0 %v1958_v38  ;;  %1121 = vmatpush2.bf16.msra.mxu1 %v2001_v2 }
  0xa5   :  { %1122 = vmatprep.subr.bf16.mxu1 %v2006_v3  ;;  %v193_v38 = vshrl.u32 %v192_v37, 7 }
  0xa7   :  { %829 = vmatpush2.bf16.msra.mxu0 %v1956_v39  ;;  %v2286_v39 = vsub.s32 0, %v193_v38 }
  0xa8   :  { %830 = vmatprep.subr.bf16.mxu0 %v1961_v40  ;;  %1123 = vmatpush2.bf16.msra.mxu1 %v2004_v4  ;;  %v190_v40 = vld [vmem:[%s2313_s2] sm:$0x3]  ;;  %v2039_v4 = vld [vmem:[#allocation6 + $0x14] ss:$8 sps:$4 sm:$0xff]  }
  0xa9   :  { %1124 = vmatprep.subr.bf16.mxu1 %v2009_v6  ;;  %v2042_v6 = vld [vmem:[#allocation6 + $0x4] ss:$8 sps:$4 sm:$0xff]  }
  0xab   :  { %831 = vmatpush2.bf16.msra.mxu0 %v1959_v41  ;;  %v2291_v41 = vsub.s32 1, %v193_v38 }
  0xac   :  { %832 = vmatprep.subr.bf16.mxu0 %v1967_v42  ;;  %1125 = vmatpush2.bf16.msra.mxu1 %v2007_v5  ;;  %v195_v42 = vrot.slane %v190_v40, %v2286_v39  ;;  %v2037_v5 = vld [vmem:[#allocation6 + $0x10] ss:$8 sps:$4 sm:$0xff]  }
  0xad   :  { %1126 = vmatprep.subr.bf16.mxu1 %v2012_v7  ;;  %v2040_v7 = vld [vmem:[#allocation6] ss:$8 sps:$4 sm:$0xff]  }
  0xaf   :  { %833 = vmatpush2.bf16.msra.mxu0 %v1965_v43  ;;  %v199_v43 = vrot.slane %v190_v40, %v2291_v41 }
  0xb0   :  { %1127 = vmatpush2.bf16.msra.mxu1 %v2010_v8  ;;  %1357 = vmatprep.subr.bf16.mxu0 %v2021_v14  ;;  %v2045_v8 = vld [vmem:[#allocation6 + $0xf4] ss:$8 sps:$4 sm:$0xff]   ;;  %v2054_v14 = vld [vmem:[#allocation6 + $0xc4] ss:$8 sps:$4 sm:$0xff]  }
  0xb1   :  { %1128 = vmatprep.subr.bf16.mxu1 %v2015_v9  ;;  %v2043_v9 = vld [vmem:[#allocation6 + $0xf0] ss:$8 sps:$4 sm:$0xff]  }
  0xb2   :  { %835 = vmatmul.mubr.bf16.vlgmr.msra.gmra.mxu0 %v1603_v44 }
  0xb3   :  { %1358 = vmatpush1.bf16.msra.mxu0 %v2019_v13  ;;  %v2049_v13 = vld [vmem:[#allocation6 + $0xd0] ss:$8 sps:$4 sm:$0xff]  }
  0xb4   :  { %1129 = vmatpush2.bf16.msra.mxu1 %v2013_v10  ;;  %1359 = vmatprep.subr.bf16.mxu0 %v2024_v15  ;;  %v2048_v10 = vld [vmem:[#allocation6 + $0xe4] ss:$8 sps:$4 sm:$0xff]   ;;  %v2052_v15 = vld [vmem:[#allocation6 + $0xc0] ss:$8 sps:$4 sm:$0xff]  }
  0xb5   :  { %1130 = vmatprep.subr.bf16.mxu1 %v2018_v11  ;;  %v2046_v11 = vld [vmem:[#allocation6 + $0xe0] ss:$8 sps:$4 sm:$0xff]  }
  0xb7   :  { %1360 = vmatpush1.bf16.msra.mxu0 %v2022_v16  ;;  %v2057_v16 = vld [vmem:[#allocation6 + $0xb4] ss:$8 sps:$4 sm:$0xff]  }
  0xb8   :  { %1131 = vmatpush2.bf16.msra.mxu1 %v2016_v12  ;;  %1361 = vmatprep.subr.bf16.mxu0 %v2027_v17  ;;  %v2051_v12 = vld [vmem:[#allocation6 + $0xd4] ss:$8 sps:$4 sm:$0xff]   ;;  %v2055_v17 = vld [vmem:[#allocation6 + $0xb0] ss:$8 sps:$4 sm:$0xff]  }
  0xbb   :  { %1362 = vmatpush1.bf16.msra.mxu0 %v2025_v18  ;;  %v2060_v18 = vld [vmem:[#allocation6 + $0xa4] ss:$8 sps:$4 sm:$0xff]  }
  0xbc   :  { %1363 = vmatprep.subr.bf16.mxu0 %v2030_v19  ;;  %v2058_v19 = vld [vmem:[#allocation6 + $0xa0] ss:$8 sps:$4 sm:$0xff]  }
  0xbf   :  { %1364 = vmatpush1.bf16.msra.mxu0 %v2028_v20  ;;  %v2063_v20 = vld [vmem:[#allocation6 + $0x94] ss:$8 sps:$4 sm:$0xff]  }
  0xc0   :  { %1365 = vmatprep.subr.bf16.mxu0 %v2033_v21  ;;  %v2061_v21 = vld [vmem:[#allocation6 + $0x90] ss:$8 sps:$4 sm:$0xff]  }
  0xc3   :  { %1366 = vmatpush1.bf16.msra.mxu0 %v2031_v22  ;;  %v2066_v22 = vld [vmem:[#allocation6 + $0x84] ss:$8 sps:$4 sm:$0xff]  }
  0xc4   :  { %1367 = vmatprep.subr.bf16.mxu0 %v2036_v23  ;;  %v2064_v23 = vld [vmem:[#allocation6 + $0x80] ss:$8 sps:$4 sm:$0xff]  }
  0xc7   :  { %1368 = vmatpush1.bf16.msra.mxu0 %v2034_v24  ;;  %v928_v24 = vld [vmem:[%s2315_s4] sm:$0x3] }
  0xc8   :  { %1369 = vmatprep.subr.bf16.mxu0 %v2039_v4 }
  0xcb   :  { %1370 = vmatpush1.bf16.msra.mxu0 %v2037_v5 }
  0xcc   :  { %1371 = vmatprep.subr.bf16.mxu0 %v2042_v6 }
  0xcf   :  { %1372 = vmatpush1.bf16.msra.mxu0 %v2040_v7 }
  0xd0   :  { %1373 = vmatprep.subr.bf16.mxu0 %v2045_v8 }
  0xd3   :  { %1374 = vmatpush2.bf16.msra.mxu0 %v2043_v9 }
  0xd4   :  { %1375 = vmatprep.subr.bf16.mxu0 %v2048_v10 }
  0xd7   :  { %1376 = vmatpush2.bf16.msra.mxu0 %v2046_v11 }
  0xd8   :  { %1377 = vmatprep.subr.bf16.mxu0 %v2051_v12 }
  0xdb   :  { %1378 = vmatpush2.bf16.msra.mxu0 %v2049_v13 }
  0xdc   :  { %1379 = vmatprep.subr.bf16.mxu0 %v2054_v14 }
  0xdf   :  { %1380 = vmatpush2.bf16.msra.mxu0 %v2052_v15 }
  0xe0   :  { %1381 = vmatprep.subr.bf16.mxu0 %v2057_v16 }
  0xe3   :  { %1382 = vmatpush2.bf16.msra.mxu0 %v2055_v17 }
  0xe4   :  { %1383 = vmatprep.subr.bf16.mxu0 %v2060_v18 }
  0xe7   :  { %1384 = vmatpush2.bf16.msra.mxu0 %v2058_v19  ;;  %v1769_v19 = vld [vmem:[%s2319_s8] ss:$0 sm:$0xff] }
  0xe8   :  { %1385 = vmatprep.subr.bf16.mxu0 %v2063_v20 }
  0xeb   :  { %1386 = vmatpush2.bf16.msra.mxu0 %v2061_v21 }
  0xec   :  { %1387 = vmatprep.subr.bf16.mxu0 %v2066_v22 }
  0xef   :  { %1388 = vmatpush2.bf16.msra.mxu0 %v2064_v23 }
 0x132   :  { %v754_v25 = vpop.f32.mrf.mxu0 }
 0x133   :  { %v795_v27 = vpop.f32.mrf.mxu1  ;;  %v755_v44 = vadd.f32 %v754_v25, %v195_v42  ;;  %v933_v25 = vrot.slane %v928_v24, %v2286_v39 }
 0x134   :  { %v756_v26 = vpop.f32.mrf.mxu0 }
 0x135   :  { %v797_v29 = vpop.f32.mrf.mxu1  ;;  %v757_v45 = vadd.f32 %v756_v26, %v199_v43  ;;  %v796_v46 = vadd.f32 %v795_v27, %v755_v44  ;;  %v937_v26 = vrot.slane %v928_v24, %v2291_v41 }
 0x136   :  { %v758_v28 = vpop.f32.mrf.mxu0 }
 0x137   :  { %v799_v31 = vpop.f32.mrf.mxu1  ;;  %v798_v48 = vadd.f32 %v797_v29, %v757_v45 }
 0x138   :  { %v759_v30 = vpop.f32.mrf.mxu0 }
 0x139   :  { %v800_v32 = vpop.f32.mrf.mxu1 }
 0x13b   :  { %v877_v33 = vpop.f32.mrf.mxu1 }
 0x13d   :  { %v879_v34 = vpop.f32.mrf.mxu1 }
 0x13f   :  { %v881_v35 = vpop.f32.mrf.mxu1 }
 0x141   :  { %v882_v36 = vpop.f32.mrf.mxu1 }
 0x172   :  { %v836_v47 = vpop.f32.mrf.mxu0 }
 0x173   :  { %v837_v49 = vadd.f32 %v836_v47, %v796_v46  ;;  %v2067_v47 = vld [vmem:[#allocation7 + $0x78] sm:$0xff]  }
 0x174   :  { %v838_v50 = vpop.f32.mrf.mxu0  ;;  %1786 = vmatprep.subr.bf16.mxu1 %v2067_v47 }
 0x175   :  { %v878_v51 = vadd.f32 %v877_v33, %v837_v49  ;;  %v839_v52 = vadd.f32 %v838_v50, %v798_v48  ;;  %v2068_v48 = vld [vmem:[#allocation7 + $0x38] sm:$0xff]   ;;  %v2069_v49 = vld [vmem:[#allocation7 + $0x70] sm:$0xff]  }
 0x176   :  { %v840_v53 = vpop.f32.mrf.mxu0  ;;  %v2070_v50 = vld [vmem:[#allocation7 + $0x30] sm:$0xff]  }
 0x177   :  { %v884_v54 = vsub.f32 0.0, %v878_v51  ;;  %v880_v55 = vadd.f32 %v879_v34, %v839_v52  ;;  %v2071_v51 = vld [vmem:[#allocation7 + $0x68] sm:$0xff]   ;;  %v2073_v53 = vld [vmem:[#allocation7 + $0x60] sm:$0xff]  }
 0x178   :  { %v841_v56 = vpop.f32.mrf.mxu0  ;;  %v2072_v52 = vld [vmem:[#allocation7 + $0x28] sm:$0xff]  }
 0x179   :  { %v886_v57 = vmul.f32 1.442695, %v884_v54  ;;  %v885_v58 = vsub.f32 0.0, %v880_v55  ;;  %v2074_v54 = vld [vmem:[#allocation7 + $0x20] sm:$0xff]   ;;  %v2075_v55 = vld [vmem:[#allocation7 + $0x58] sm:$0xff]  }
 0x17a   :  { %v2076_v56 = vld [vmem:[#allocation7 + $0x18] sm:$0xff]  }
 0x17b   :  { %2083 = vpow2.f32 %v886_v57  ;;  %v888_v59 = vmul.f32 1.442695, %v885_v58  ;;  %v2077_v57 = vld [vmem:[#allocation7 + $0x50] sm:$0xff]  }
 0x17c   :  { %v2078_v58 = vld [vmem:[#allocation7 + $0x10] sm:$0xff]  }
 0x17d   :  { %2085 = vpow2.f32 %v888_v59  ;;  %v2079_v59 = vld [vmem:[#allocation7 + $0x48] sm:$0xff]  }
 0x188   :  { %v2084_v60 = vpop.eup %2083 }
 0x189   :  { %v890_v61 = vadd.f32 1.0, %v2084_v60  ;;  %v2080_v60 = vld [vmem:[#allocation7 + $0x8] sm:$0xff]  }
 0x18a   :  { %v2086_v62 = vpop.eup %2085 }
 0x18b   :  { %v891_v63 = vadd.f32 1.0, %v2086_v62  ;;  %2087 = vrcp.f32 %v890_v61  ;;  %v2081_v61 = vld [vmem:[#allocation7 + $0x40] sm:$0xff]  }
 0x18c   :  { %v2082_v62 = vld [vmem:[#allocation7] sm:$0xff]  }
 0x18d   :  { %2089 = vrcp.f32 %v891_v63  ;;  %v1185_v63 = vld [vmem:[%s2317_s6] sm:$0x3] }
 0x198   :  { %v2088_v0 = vpop.eup %2087 }
 0x199   :  { %v894_v3 = vpack.c.bf16 %v2088_v0, %v2088_v0  ;;  %v1190_v0 = vrot.slane %v1185_v63, %v2286_v39 }
 0x19a   :  { %v2090_v1 = vpop.eup %2089 }
 0x19b   :  { %v895_v2 = vpack.c.bf16 %v2090_v1, %v2090_v1  ;;  %v1194_v1 = vrot.slane %v1185_v63, %v2291_v41 }
 0x19d   :  { %1132 = vmatprep.mubr.bf16.mxu1 %v895_v2 }
 0x19e   :  { %1133 = vmatmul.mubr.bf16.vlgmr.msra.gmra.mxu1 %v894_v3 }
 0x19f   :  { %1787 = vmatpush3.bf16.msra.mxu1 %v2068_v48 }
 0x1a0   :  { %1788 = vmatprep.subr.bf16.mxu1 %v2069_v49 }
 0x1a3   :  { %1789 = vmatpush3.bf16.msra.mxu1 %v2070_v50 }
 0x1a4   :  { %1790 = vmatprep.subr.bf16.mxu1 %v2071_v51 }
 0x1a7   :  { %1791 = vmatpush3.bf16.msra.mxu1 %v2072_v52 }
 0x1a8   :  { %1792 = vmatprep.subr.bf16.mxu1 %v2073_v53 }
 0x1ab   :  { %1793 = vmatpush3.bf16.msra.mxu1 %v2074_v54 }
 0x1ac   :  { %1794 = vmatprep.subr.bf16.mxu1 %v2075_v55 }
 0x1af   :  { %1795 = vmatpush3.bf16.msra.mxu1 %v2076_v56 }
 0x1b0   :  { %1796 = vmatprep.subr.bf16.mxu1 %v2077_v57 }
 0x1b3   :  { %1797 = vmatpush3.bf16.msra.mxu1 %v2078_v58 }
 0x1b4   :  { %1798 = vmatprep.subr.bf16.mxu1 %v2079_v59 }
 0x1b7   :  { %1799 = vmatpush3.bf16.msra.mxu1 %v2080_v60 }
 0x1b8   :  { %1800 = vmatprep.subr.bf16.mxu1 %v2081_v61 }
 0x1bb   :  { %1801 = vmatpush3.bf16.msra.mxu1 %v2082_v62 }
 0x25e   :  { %v1134_v27 = vpop.f32.mrf.mxu1 }
 0x25f   :  { %v1135_v28 = vadd.f32 %v1134_v27, %v933_v25 }
 0x260   :  { %v1136_v29 = vpop.f32.mrf.mxu1 }
 0x261   :  { %v1141_v30 = vsub.f32 0.0, %v1135_v28  ;;  %v1137_v31 = vadd.f32 %v1136_v29, %v937_v26 }
 0x262   :  { %v1138_v32 = vpop.f32.mrf.mxu1 }
 0x263   :  { %v1143_v33 = vmul.f32 1.442695, %v1141_v30  ;;  %v1142_v34 = vsub.f32 0.0, %v1137_v31 }
 0x264   :  { %v1139_v35 = vpop.f32.mrf.mxu1 }
 0x265   :  { %2091 = vpow2.f32 %v1143_v33  ;;  %v1145_v36 = vmul.f32 1.442695, %v1142_v34 }
 0x267   :  { %2093 = vpow2.f32 %v1145_v36 }
 0x272   :  { %v2092_v37 = vpop.eup %2091 }
 0x273   :  { %v1147_v38 = vadd.f32 1.0, %v2092_v37 }
 0x274   :  { %v2094_v40 = vpop.eup %2093 }
 0x275   :  { %v1148_v42 = vadd.f32 1.0, %v2094_v40  ;;  %2095 = vrcp.f32 %v1147_v38 }
 0x277   :  { %2097 = vrcp.f32 %v1148_v42 }
 0x282   :  { %v2096_v43 = vpop.eup %2095 }
 0x283   :  { %v1151_v46 = vpack.c.bf16 %v2096_v43, %v2096_v43 }
 0x284   :  { %v2098_v44 = vpop.eup %2097 }
 0x285   :  { %v1152_v45 = vpack.c.bf16 %v2098_v44, %v2098_v44 }
 0x287   :  { %1389 = vmatprep.mubr.bf16.mxu0 %v1152_v45 }
 0x288   :  { %1390 = vmatmul.mubr.bf16.vlgmr.msra.gmra.mxu0 %v1151_v46 }
 0x348   :  { %v1391_v2 = vpop.f32.mrf.mxu0 }
 0x349   :  { %v1392_v3 = vadd.f32 %v1391_v2, %v1190_v0 }
 0x34a   :  { %v1393_v4 = vpop.f32.mrf.mxu0 }
 0x34b   :  { %v1398_v5 = vsub.f32 0.0, %v1392_v3  ;;  %v1394_v6 = vadd.f32 %v1393_v4, %v1194_v1 }
 0x34c   :  { %v1395_v7 = vpop.f32.mrf.mxu0 }
 0x34d   :  { %v1400_v8 = vmul.f32 1.442695, %v1398_v5  ;;  %v1399_v9 = vsub.f32 0.0, %v1394_v6 }
 0x34e   :  { %v1396_v10 = vpop.f32.mrf.mxu0 }
 0x34f   :  { %2099 = vpow2.f32 %v1400_v8  ;;  %v1402_v11 = vmul.f32 1.442695, %v1399_v9 }
 0x351   :  { %2101 = vpow2.f32 %v1402_v11 }
 0x35c   :  { %v2100_v12 = vpop.eup %2099 }
 0x35d   :  { %v1404_v13 = vadd.f32 1.0, %v2100_v12 }
 0x35e   :  { %v2102_v14 = vpop.eup %2101 }
 0x35f   :  { %v1405_v15 = vadd.f32 1.0, %v2102_v14  ;;  %2103 = vrcp.f32 %v1404_v13 }
 0x361   :  { %2105 = vrcp.f32 %v1405_v15 }
 0x36c   :  { %v2104_v39 = vpop.eup %2103 }
 0x36d   :  { %v1408_v17 = vpack.c.bf16 %v2104_v39, %v2104_v39 }
 0x36e   :  { %v2106_v41 = vpop.eup %2105 }
 0x36f   :  { %v1409_v16 = vpack.c.bf16 %v2106_v41, %v2106_v41 }
 0x371   :  { %1577 = vmatprep.mubr.bf16.mxu1 %v1409_v16 }
 0x372   :  { %1578 = vmatmul.mubr.bf16.vlgmr.msra.gmra.mxu1 %v1408_v17 }
 0x432   :  { %v1802_v18 = vpop.f32.mrf.mxu1 }
 0x434   :  { %v1803_v20 = vpop.f32.mrf.mxu1 }
 0x435   :  { %v1804_v21 = vadd.f32 %v1803_v20, %v1802_v18 }
 0x436   :  { %v1805_v22 = vpop.f32.mrf.mxu1 }
 0x437   :  { %v1580_v23 = vadd.f32 %v1804_v21, %v1769_v19 }
 0x438   :  { %v1806_v24 = vpop.f32.mrf.mxu1 }
 0x439   :  { %v1585_v25 = vsub.f32 0.0, %v1580_v23 }
 0x43b   :  { %v1586_v26 = vmul.f32 1.442695, %v1585_v25 }
 0x43d   :  { %2107 = vpow2.f32 %v1586_v26 }
 0x44a   :  { %v2108_v27 = vpop.eup %2107 }
 0x44b   :  { %v1588_v28 = vadd.f32 1.0, %v2108_v27 }
 0x44d   :  { %2109 = vrcp.f32 %v1588_v28 }
 0x45a   :  { %v2110_v29 = vpop.eup %2109 }
 0x45b   :  { %v1590_v30 = vpack.c.bf16 %v2110_v29, %v2110_v29 }
 0x45d   :  { %1591 = vst [vmem:[%s2320_s9] sm:$0xf] %v1590_v30 }
 0x45e   :  { %1596 = vsyncpa [#allocation3], 1 }
 0x45f   :  { %1597 = vsyncpa [#allocation5], 1 }
 0x460   :  { %1598 = vsyncpa [#allocation8], 1 }

</bundles_post_ra>
